<compile_context>
chip_gen: v7x
topology: tpu7x:2x2x1
jax: 0.10.0
libtpu: 0.0.40
codegen_flags: <defaults>
</compile_context>

<pallas_src>
import jax
import jax.numpy as jnp
from jax import lax
from jax.experimental import pallas as pl
from jax.experimental.pallas import tpu as pltpu


def _va_kernel(x_ref, cb_ref, wbd_ref, w2_ref, b2_ref, o_ref):
    # x_ref:   (TK, N*C)  lane-dense paca features (native dtype)
    # cb_ref:  (TK, 1)    precomputed voxel-center bias: ctr @ w1_ctr + b1
    # wbd_ref: (N*C, N)   block-diagonal fc1 feature weights
    # w2_ref:  (1, N)     fc2 weights
    # b2_ref:  (1,)       fc2 bias (SMEM scalar)
    # o_ref:   (TK, 1)    per-voxel attention weight
    x = x_ref[...]

    # fc1 over the channel axis as a single MXU matmul against the
    # block-diagonal weight:  a[k, n] = sum_c x[k, n*C + c] * w1_feat[c]
    a = jnp.dot(x, wbd_ref[...],
                preferred_element_type=jnp.float32,
                precision=lax.Precision.HIGHEST)                    # (TK, N)

    feat2 = jnp.maximum(a + cb_ref[...], 0.0)                       # relu(fc1)

    # fc2 contracts the (small) points-per-voxel axis, then relu + sigmoid.
    s = jnp.sum(feat2 * w2_ref[...], axis=-1, keepdims=True) + b2_ref[0]
    s = jnp.maximum(s, 0.0)
    o_ref[...] = (1.0 / (1.0 + jnp.exp(-s))).astype(o_ref.dtype)


def _choose_tile(K, NC, itemsize, *, target_bytes=4 << 20, tk_max=2048):
    # ~4 MiB per streamed paca block: double-buffered this stays well under
    # the scoped VMEM limit on every generation (incl. v7x's 64 MiB VMEM)
    # while keeping the ~0.35 us/step overhead negligible.
    tk = target_bytes // max(1, NC * itemsize)
    tk = int(max(8, min(tk_max, (tk // 8) * 8)))
    if K > 8:
        # Ensure >=2 grid steps when K allows it (megacore sharding on v7x).
        half = ((-(-K // 2)) + 7) // 8 * 8
        tk = min(tk, half)
    else:
        tk = 8
    return tk


def va_layer(voxel_center, paca_feat, w1, b1, w2, b2, *, tk=None):
    """VALayer forward.

    voxel_center: (K, 1, 3)
    paca_feat:    (K, N, C)   (f32 or bf16; consumed in its native dtype)
    w1: (1, C+3), b1: (1,)    -- fc1 = Linear(c_num + 3, 1)
    w2: (1, N),   b2: (1,)    -- fc2 = Linear(p_num, 1)   (p_num == N)
    returns: (K, 1, 1) voxel attention weights, f32
    """
    K, N, C = paca_feat.shape
    NC = N * C
    in_dtype = paca_feat.dtype

    # Lane-dense input: contiguous reshape -> no data movement, no upcast copy.
    x2d = paca_feat.reshape(K, NC)

    # Split fc1: first C weights act on paca_feat, last 3 on the voxel center.
    w1f32 = w1.astype(jnp.float32)
    w1_feat = w1f32[0, :C]                                            # (C,)
    w1_ctr = w1f32[0, C:]                                             # (3,)

    # Fold the center part + b1 into a per-voxel scalar (touches K*3 elems).
    ctr = voxel_center.reshape(K, 3).astype(jnp.float32)
    ctr_bias = ctr @ w1_ctr.reshape(3, 1) + b1.reshape(1, 1).astype(jnp.float32)  # (K,1)

    # Block-diagonal fc1 feature weight (N*C, N): column n holds w1_feat in
    # rows n*C..(n+1)*C-1, so the fc1 contraction runs on the MXU.
    w_bd = jnp.kron(jnp.eye(N, dtype=jnp.float32),
                    w1_feat.reshape(C, 1)).astype(in_dtype)           # (NC, N)

    w2r = w2.reshape(1, N).astype(jnp.float32)
    b2s = b2.reshape(1).astype(jnp.float32)

    if tk is None:
        tk = _choose_tile(K, NC, jnp.dtype(in_dtype).itemsize)
    tk = max(8, (tk // 8) * 8)
    grid = (pl.cdiv(K, tk),)            # ragged last block, no jnp.pad copy

    out = pl.pallas_call(
        _va_kernel,
        out_shape=jax.ShapeDtypeStruct((K, 1), jnp.float32),
        grid=grid,
        in_specs=[
            pl.BlockSpec((tk, NC), lambda i: (i, 0)),       # paca (streamed)
            pl.BlockSpec((tk, 1), lambda i: (i, 0)),        # ctr_bias
            pl.BlockSpec((NC, N), lambda i: (0, 0)),        # W_bd (resident)
            pl.BlockSpec((1, N), lambda i: (0, 0)),         # fc2 weights
            pl.BlockSpec(memory_space=pltpu.MemorySpace.SMEM),  # fc2 bias
        ],
        out_specs=pl.BlockSpec((tk, 1), lambda i: (i, 0)),
        compiler_params=pltpu.CompilerParams(
            dimension_semantics=("parallel",),
            vmem_limit_bytes=32 * 1024 * 1024),
    )(x2d, ctr_bias, w_bd, w2r, b2s)

    return out.reshape(K, 1, 1)


def va_layer_ref(voxel_center, paca_feat, w1, b1, w2, b2):
    """Pure-JAX reference mirroring the PyTorch forward graph."""
    K, N, C = paca_feat.shape
    ctr_rep = jnp.broadcast_to(voxel_center, (K, N, 3))
    cat = jnp.concatenate([paca_feat.astype(jnp.float32), ctr_rep], axis=-1)
    f1 = jnp.maximum(jnp.einsum("knd,d->kn", cat, w1[0]) + b1[0], 0.0)
    f2 = jnp.maximum(jnp.sum(f1 * w2[0], axis=-1) + b2[0], 0.0)
    return (1.0 / (1.0 + jnp.exp(-f2))).reshape(K, 1, 1)


if __name__ == "__main__":
    N, C = 8, 16   # p_num=8 points/voxel, c_num=16 channels

    # Test both an evenly-divided grid (K=32) and a ragged last block (K=37).
    for K in (32, 37):
        key = jax.random.PRNGKey(0)
        k1, k2, k3, k4, k5, k6 = jax.random.split(key, 6)

        paca_feat = jax.random.normal(k1, (K, N, C), dtype=jnp.float32)
        voxel_center = jax.random.normal(k2, (K, 1, 3), dtype=jnp.float32)

        # nn.Linear-style parameter shapes:
        #   fc1: Linear(C+3, 1) -> weight (1, C+3), bias (1,)
        #   fc2: Linear(N, 1)   -> weight (1, N),   bias (1,)
        bound1 = 1.0 / ((C + 3) ** 0.5)
        w1 = jax.random.uniform(k3, (1, C + 3), minval=-bound1, maxval=bound1,
                                dtype=jnp.float32)
        b1 = jax.random.uniform(k4, (1,), minval=-bound1, maxval=bound1,
                                dtype=jnp.float32)
        bound2 = 1.0 / (N ** 0.5)
        w2 = jax.random.uniform(k5, (1, N), minval=-bound2, maxval=bound2,
                                dtype=jnp.float32)
        b2 = jax.random.uniform(k6, (1,), minval=-bound2, maxval=bound2,
                                dtype=jnp.float32)

        out = va_layer(voxel_center, paca_feat, w1, b1, w2, b2)
        out = jax.block_until_ready(out)

        ref = va_layer_ref(voxel_center, paca_feat, w1, b1, w2, b2)
        assert out.shape == (K, 1, 1)
        assert jnp.allclose(out, ref, atol=1e-5, rtol=1e-5), (
            K, float(jnp.max(jnp.abs(out - ref))))

    print("KERNEL_OK")
</pallas_src>

<mosaic_0001>
module attributes {stable_mosaic.version = 11 : i64} {
  func.func @_va_kernel(%arg0: i32, %arg1: memref<16x128xf32, #tpu.memory_space<vmem>>, %arg2: memref<16x1xf32, #tpu.memory_space<vmem>>, %arg3: memref<128x8xf32, #tpu.memory_space<vmem>>, %arg4: memref<1x8xf32, #tpu.memory_space<vmem>>, %arg5: memref<1xf32, #tpu.memory_space<smem>>, %arg6: memref<16x1xf32, #tpu.memory_space<vmem>>) attributes {dimension_semantics = [#tpu.dimension_semantics<parallel>], iteration_bounds = array<i64: 2>, scalar_prefetch = 0 : i64, scratch_operands = 0 : i64, tpu.core_type = #tpu.core_type<tc>, window_params = [{transform_indices = @transform_0, window_bounds = array<i64: 16, 128>}, {transform_indices = @transform_1, window_bounds = array<i64: 16, 1>}, {pipeline_mode = #tpu.pipeline_mode<synchronous>, transform_indices = @transform_2, window_bounds = array<i64: 128, 8>}, {pipeline_mode = #tpu.pipeline_mode<synchronous>, transform_indices = @transform_3, window_bounds = array<i64: 1, 8>}, {transform_indices = @transform_4, window_bounds = array<i64: 1>}, {transform_indices = @transform_5, window_bounds = array<i64: 16, 1>}]} {
    %c0 = arith.constant 0 : index
    %c0_0 = arith.constant 0 : index
    %0 = vector.load %arg1[%c0, %c0_0] : memref<16x128xf32, #tpu.memory_space<vmem>>, vector<16x128xf32>
    %c0_1 = arith.constant 0 : index
    %c0_2 = arith.constant 0 : index
    %1 = vector.load %arg3[%c0_1, %c0_2] : memref<128x8xf32, #tpu.memory_space<vmem>>, vector<128x8xf32>
    %cst = arith.constant dense<0.000000e+00> : vector<16x8xf32>
    %2 = tpu.matmul %0, %1, %cst {dimension_numbers = #tpu.dot_dimension_numbers<[1], [0], [0], [1], [0, 0, 1, 1], [], []>, precision = #tpu.contract_precision<fp32>} : vector<16x128xf32>, vector<128x8xf32>, vector<16x8xf32> -> vector<16x8xf32>
    %c0_3 = arith.constant 0 : index
    %c0_4 = arith.constant 0 : index
    %3 = vector.load %arg2[%c0_3, %c0_4] : memref<16x1xf32, #tpu.memory_space<vmem>>, vector<16x1xf32>
    %4 = vector.broadcast %3 : vector<16x1xf32> to vector<16x8xf32>
    %5 = arith.addf %2, %4 : vector<16x8xf32>
    %cst_5 = arith.constant 0.000000e+00 : f32
    %6 = vector.broadcast %cst_5 : f32 to vector<16x8xf32>
    %7 = arith.maximumf %5, %6 : vector<16x8xf32>
    %c0_6 = arith.constant 0 : index
    %c0_7 = arith.constant 0 : index
    %8 = vector.load %arg4[%c0_6, %c0_7] : memref<1x8xf32, #tpu.memory_space<vmem>>, vector<1x8xf32>
    %9 = vector.broadcast %8 : vector<1x8xf32> to vector<16x8xf32>
    %10 = arith.mulf %7, %9 : vector<16x8xf32>
    %cst_8 = arith.constant dense<0.000000e+00> : vector<16xf32>
    %11 = vector.multi_reduction <add>, %10, %cst_8 [1] : vector<16x8xf32> to vector<16xf32>
    %12 = vector.shape_cast %11 : vector<16xf32> to vector<16x1xf32>
    %c0_9 = arith.constant 0 : index
    %13 = memref.load %arg5[%c0_9] : memref<1xf32, #tpu.memory_space<smem>>
    %14 = vector.broadcast %13 : f32 to vector<16x1xf32>
    %15 = arith.addf %12, %14 : vector<16x1xf32>
    %cst_10 = arith.constant 0.000000e+00 : f32
    %16 = vector.broadcast %cst_10 : f32 to vector<16x1xf32>
    %17 = arith.maximumf %15, %16 : vector<16x1xf32>
    %cst_11 = arith.constant 0.000000e+00 : f32
    %18 = vector.broadcast %cst_11 : f32 to vector<16x1xf32>
    %19 = arith.subf %18, %17 : vector<16x1xf32>
    %20 = math.exp %19 : vector<16x1xf32>
    %cst_12 = arith.constant 1.000000e+00 : f32
    %21 = vector.broadcast %cst_12 : f32 to vector<16x1xf32>
    %22 = arith.addf %21, %20 : vector<16x1xf32>
    %cst_13 = arith.constant 1.000000e+00 : f32
    %23 = vector.broadcast %cst_13 : f32 to vector<16x1xf32>
    %24 = arith.divf %23, %22 : vector<16x1xf32>
    %c0_14 = arith.constant 0 : index
    %c0_15 = arith.constant 0 : index
    %25 = vector.load %arg6[%c0_14, %c0_15] : memref<16x1xf32, #tpu.memory_space<vmem>>, vector<16x1xf32>
    tpu.vector_store %arg6[%c0_14, %c0_15], %24 {strides = array<i32>} : memref<16x1xf32, #tpu.memory_space<vmem>>, vector<16x1xf32>,
    return
  }
  func.func @transform_0(%arg0: i32) -> (i32, i32) {
    %c0_i32 = arith.constant 0 : i32
    %c0_i32_0 = arith.constant 0 : i32
    return %arg0, %c0_i32 : i32, i32
  }
  func.func @transform_1(%arg0: i32) -> (i32, i32) {
    %c0_i32 = arith.constant 0 : i32
    %c0_i32_0 = arith.constant 0 : i32
    return %arg0, %c0_i32 : i32, i32
  }
  func.func @transform_2(%arg0: i32) -> (i32, i32) {
    %c0_i32 = arith.constant 0 : i32
    %c0_i32_0 = arith.constant 0 : i32
    %c0_i32_1 = arith.constant 0 : i32
    return %c0_i32, %c0_i32_0 : i32, i32
  }
  func.func @transform_3(%arg0: i32) -> (i32, i32) {
    %c0_i32 = arith.constant 0 : i32
    %c0_i32_0 = arith.constant 0 : i32
    %c0_i32_1 = arith.constant 0 : i32
    return %c0_i32, %c0_i32_0 : i32, i32
  }
  func.func @transform_4(%arg0: i32) -> i32 {
    %c0_i32 = arith.constant 0 : i32
    %c0_i32_0 = arith.constant 0 : i32
    return %c0_i32 : i32
  }
  func.func @transform_5(%arg0: i32) -> (i32, i32) {
    %c0_i32 = arith.constant 0 : i32
    %c0_i32_0 = arith.constant 0 : i32
    return %arg0, %c0_i32 : i32, i32
  }
}

</mosaic_0001>

<bundles_post_ra>
// kernel: tpu_custom_call.1
= control target key start
LH: loop header
LB: loop body
LE: loop exit
PB: predicated region body
PF: predicated region fallthrough
CT: control target
= control target key end

     0   :  { %s1668_s20 = smov 0   ;;  %s2022_s0 = inlined_call_operand.vmem [shape: f32[32,128], index: 0, kind: input, shape index: {}]   ;;  %s2023_s1 = inlined_call_operand.vmem [shape: f32[32,1], index: 1, kind: input, shape index: {}]   ;;  %s2024_s2 = inlined_call_operand.vmem [shape: f32[128,8], index: 2, kind: input, shape index: {}]   ;;  %s2025_s3 = inlined_call_operand.vmem [shape: f32[1,8], index: 3, kind: input, shape index: {}]   ;;  %s2026_s4 = inlined_call_operand.<no memory space> [shape: f32[1], index: 4, kind: input, shape index: {}]   ;;  %s2027_s5 = inlined_call_operand.vmem [shape: f32[32,1], index: 5, kind: output, shape index: {}]  }
   0x1   :  { %10 = sst [smem:[#allocation2]] %s2026_s4 }
   0x2 LB: > { %s1072_s21 = sadd.s32 4294967295, %s1632_s20   ;;  %p1076_p0 = scmp.ge.s32.totalorder %s1632_s20, 1  ;;  %s1632_s20 = sphi %s1668_s20, %s16_s20  }
   0x3   : > { %p200_p1 = scmp.lt.s32.totalorder %s1632_s20, 3 }
   0x5   : > { %p201_p2 = pnand %p1076_p0, %p200_p1 }
   0x6   : > { %v253_v0 = vld [vmem:[%s2024_s2] sm:$0xff] (!%p201_p2)  ;;  %v254_v1 = vld [vmem:[%s2024_s2 + $0x8] sm:$0xff] (!%p201_p2)  ;;  %v1685_v2 = vld [vmem:[%s2024_s2 + $0x10] sm:$0xff] (!%p201_p2)  ;;  %s1077_s27 = sshll.u32 (!%p201_p2), %s1072_s21, 1  ;;  %v1634_v9 = vmov (!%p201_p2), 0   ;;  %vm976_vm0 = vcmask (!%p201_p2), 64512  }
   0x7   : > { %204 = sbr.rel (%p201_p2) target bundleno = 508 (0x1fc), region = 40  ;;  %v282_v3 = vand.u32 (!%p201_p2), 4294901760, %v253_v0  ;;  %v285_v4 = vand.u32 (!%p201_p2), 4294901760, %v254_v1  ;;  %v1690_v5 = vld [vmem:[%s2024_s2 + $0x18] sm:$0xff] (!%p201_p2)  ;;  %v288_v6 = vand.u32 (!%p201_p2), 4294901760, %v1685_v2  ;;  %v1696_v7 = vld [vmem:[%s2024_s2 + $0x20] sm:$0xff] (!%p201_p2)  ;;  %1617 = vset.pattern.permute.xlu0 (!%p201_p2), %v1634_v9 }
   0x8   : > { %v1701_v8 = vld [vmem:[%s2024_s2 + $0x28] sm:$0xff] (!%p201_p2)  ;;  %v291_v10 = vand.u32 (!%p201_p2), 4294901760, %v1690_v5  ;;  %v294_v12 = vand.u32 (!%p201_p2), 4294901760, %v1696_v7  ;;  %v1717_v15 = vld [vmem:[%s2024_s2 + $0x30] sm:$0xff] (!%p201_p2)  ;;  %v1722_v16 = vld [vmem:[%s2024_s2 + $0x38] sm:$0xff] (!%p201_p2)  ;;  %p234_p3 = scmp.lt.s32.totalorder (!%p201_p2), %s1077_s27, 3 }
   0x9   : > { %v1704_v11 = vpack.c.bf16 (!%p201_p2), %v285_v4, %v282_v3  ;;  %v297_v13 = vand.u32 (!%p201_p2), 4294901760, %v1701_v8  ;;  %v300_v18 = vand.u32 (!%p201_p2), 4294901760, %v1717_v15  ;;  %v303_v19 = vand.u32 (!%p201_p2), 4294901760, %v1722_v16  ;;  %v1741_v20 = vld [vmem:[%s2024_s2 + $0x40] sm:$0xff] (!%p201_p2)  ;;  %v1746_v21 = vld [vmem:[%s2024_s2 + $0x48] sm:$0xff] (!%p201_p2)  ;;  %v1773_v26 = vld [vmem:[%s2024_s2 + $0x50] sm:$0xff] (!%p201_p2) }
   0xa   : > { %v1712_v14 = vpack.c.bf16 (!%p201_p2), %v291_v10, %v288_v6  ;;  %v306_v24 = vand.u32 (!%p201_p2), 4294901760, %v1741_v20  ;;  %v309_v25 = vand.u32 (!%p201_p2), 4294901760, %v1746_v21  ;;  %v1780_v29 = vld [vmem:[%s2024_s2 + $0x58] sm:$0xff] (!%p201_p2)  ;;  %v312_v32 = vand.u32 (!%p201_p2), 4294901760, %v1773_v26  ;;  %v1802_v37 = vld [vmem:[%s2024_s2 + $0x60] sm:$0xff] (!%p201_p2)  ;;  %v1807_v38 = vld [vmem:[%s2024_s2 + $0x68] sm:$0xff] (!%p201_p2) }
   0xb   : > { %1405 = vmatprep.subr.bf16.mxu1 (!%p201_p2), %v1704_v11  ;;  %1501 = vmatprep.subr.bf16.mxu0 (!%p201_p2), %v1704_v11  ;;  %v1734_v17 = vpack.c.bf16 (!%p201_p2), %v297_v13, %v294_v12  ;;  %v1766_v23 = vpack.c.bf16 (!%p201_p2), %v303_v19, %v300_v18  ;;  %v1788_v34 = vsub.f32 (!%p201_p2), %v253_v0, %v282_v3  ;;  %v315_v36 = vand.u32 (!%p201_p2), 4294901760, %v1780_v29  ;;  %v1822_v45 = vld [vmem:[%s2024_s2 + $0x70] sm:$0xff] (!%p201_p2)  ;;  %v1841_v49 = vld [vmem:[%s2024_s2 + $0x78] sm:$0xff] (!%p201_p2)  ;;  %s983_s13 = sld [smem:[#allocation2]] (!%p201_p2) }
   0xc   : > { %1407 = vmatpush3.bf16.msra.mxu1 (!%p201_p2), %v1704_v11  ;;  %1503 = vmatpush3.bf16.msra.mxu0 (!%p201_p2), %v1704_v11  ;;  %v1796_v35 = vpack.c.bf16 (!%p201_p2), %v309_v25, %v306_v24  ;;  %v1810_v40 = vsub.f32 (!%p201_p2), %v254_v1, %v285_v4  ;;  %v318_v43 = vand.u32 (!%p201_p2), 4294901760, %v1802_v37  ;;  %v321_v44 = vand.u32 (!%p201_p2), 4294901760, %v1807_v38 }
   0xd   : > { %1409 = vmatprep.subr.bf16.mxu1 (!%p201_p2), %v1712_v14  ;;  %1505 = vmatprep.subr.bf16.mxu0 (!%p201_p2), %v1712_v14  ;;  %v385_v46 = vand.u32 (!%p201_p2), 4294901760, %v1788_v34  ;;  %v1828_v47 = vsub.f32 (!%p201_p2), %v1685_v2, %v288_v6  ;;  %v1836_v48 = vpack.c.bf16 (!%p201_p2), %v315_v36, %v312_v32  ;;  %v1847_v52 = vsub.f32 (!%p201_p2), %v1690_v5, %v291_v10 }
   0xe   : > { %s2029_s27 = smov (!%p234_p3, %s1077_s27), 3  ;;  %v392_v51 = vand.u32 4294901760, %v1810_v40  ;;  %v324_v53 = vand.u32 4294901760, %v1822_v45  ;;  %v1859_v55 = vpack.c.bf16 %v321_v44, %v318_v43  ;;  %v327_v56 = vand.u32 4294901760, %v1841_v49 }
   0xf   : > { %s1748_s17 = sshll.u32 %s2029_s27, 3  ;;  %v386_v57 = vsub.f32 %v1788_v34, %v385_v46  ;;  %v399_v58 = vand.u32 4294901760, %v1828_v47  ;;  %v406_v60 = vand.u32 4294901760, %v1847_v52  ;;  %v1871_v61 = vsub.f32 %v1696_v7, %v294_v12 }
  0x10   : > { %s237_s21 = scalar_lea.vmem %s2022_s0, %s1748_s17  ;;  %1411 = vmatpush3.bf16.msra.mxu1 %v1712_v14  ;;  %1507 = vmatpush3.bf16.msra.mxu0 %v1712_v14  ;;  %s243_s4 = scalar_lea.vmem %s2023_s1, %s1748_s17  ;;  %v393_v59 = vsub.f32 %v1810_v40, %v392_v51  ;;  %v1876_v62 = vsub.f32 %v1701_v8, %v297_v13  ;;  %v1882_v0 = vsub.f32 %v1717_v15, %v300_v18  ;;  %vm1001_vm1 = vcmask 7168  }
  0x11   : > { %v251_v22 = vld [vmem:[%s237_s21] sm:$0xff]  ;;  %1413 = vmatprep.subr.bf16.mxu1 %v1734_v17  ;;  %1509 = vmatprep.subr.bf16.mxu0 %v1734_v17  ;;  %v270_v31 = vld [vmem:[%s243_s4 + $0x8] sm:$0xff]  ;;  %v1887_v1 = vsub.f32 %v1722_v16, %v303_v19  ;;  %v1895_v2 = vpack.c.bf16 %v327_v56, %v324_v53  ;;  %v387_v3 = vand.u32 4294901760, %v386_v57  ;;  %v400_v4 = vsub.f32 %v1828_v47, %v399_v58  ;;  %s249_s16 = scalar_lea.vmem %s2027_s5, %s1748_s17 }
  0x12   : > { %v1775_v27 = vand.u32 4294901760, %v251_v22  ;;  %v269_v28 = vld [vmem:[%s243_s4] sm:$0xff]  ;;  %v252_v33 = vld [vmem:[%s237_s21 + $0x8] sm:$0xff]  ;;  %v394_v5 = vand.u32 4294901760, %v393_v59  ;;  %v407_v6 = vsub.f32 %v1847_v52, %v406_v60  ;;  %v413_v7 = vand.u32 4294901760, %v1871_v61 }
  0x13   : > { %273 = vperm.xlu0 %1617, %v269_v28   ;;  %v1813_v42 = vand.u32 4294901760, %v252_v33  ;;  %v420_v8 = vand.u32 4294901760, %v1876_v62  ;;  %v427_v10 = vand.u32 4294901760, %v1882_v0  ;;  %v434_v12 = vand.u32 4294901760, %v1887_v1 }
  0x14   : > { %v1783_v30 = vsub.f32 %v251_v22, %v1775_v27  ;;  %1415 = vmatpush3.bf16.msra.mxu1 %v1734_v17  ;;  %1511 = vmatpush3.bf16.msra.mxu0 %v1734_v17  ;;  %v1532_v13 = vpack.c.bf16 %v392_v51, %v385_v46  ;;  %v401_v15 = vand.u32 4294901760, %v400_v4  ;;  %v1911_v16 = vsub.f32 %v1741_v20, %v306_v24 }
  0x15   : > { %1417 = vmatprep.subr.bf16.mxu1 %v1766_v23  ;;  %1513 = vmatprep.subr.bf16.mxu0 %v1766_v23  ;;  %v1851_v54 = vsub.f32 %v252_v33, %v1813_v42  ;;  %v1916_v18 = vsub.f32 %v1746_v21, %v309_v25  ;;  %v1436_v19 = vpack.c.bf16 %v394_v5, %v387_v3  ;;  %v408_v22 = vand.u32 4294901760, %v407_v6 }
  0x16   : > { %v364_v39 = vand.u32 4294901760, %v1783_v30  ;;  %v414_v28 = vsub.f32 %v1871_v61, %v413_v7  ;;  %v435_v20 = vsub.f32 %v1887_v1, %v434_v12  ;;  %v1536_v21 = vpack.c.bf16 %v406_v60, %v399_v58 }
  0x17   : > { %278 = vperm.xlu0 %1617, %v270_v31   ;;  %v374_v63 = vand.u32 4294901760, %v1851_v54  ;;  %v421_v31 = vsub.f32 %v1876_v62, %v420_v8  ;;  %v441_v24 = vand.u32 4294901760, %v1911_v16  ;;  %v448_v25 = vand.u32 4294901760, %v1916_v18 }
  0x18   : > { %v365_v41 = vsub.f32 %v1783_v30, %v364_v39  ;;  %1331 = vmatprep.mubr.f32.mxu0 %v364_v39  ;;  %1419 = vmatpush3.bf16.msra.mxu1 %v1766_v23  ;;  %v428_v39 = vsub.f32 %v1882_v0, %v427_v10  ;;  %v1440_v46 = vpack.c.bf16 %v408_v22, %v401_v15  ;;  %v436_v59 = vand.u32 4294901760, %v435_v20 }
  0x19   : > { %1515 = vmatpush3.bf16.msra.mxu0 %v1766_v23  ;;  %1421 = vmatprep.subr.bf16.mxu1 %v1796_v35  ;;  %v375_v9 = vsub.f32 %v1851_v54, %v374_v63  ;;  %v422_v51 = vand.u32 4294901760, %v421_v31  ;;  %v1936_v57 = vsub.f32 %v1780_v29, %v315_v36  ;;  %v1941_v60 = vsub.f32 %v1802_v37, %v318_v43 }
  0x1a   : > { %1517 = vmatprep.subr.bf16.mxu0 %v1796_v35  ;;  %v366_v50 = vand.u32 4294901760, %v365_v41  ;;  %v1931_v41 = vsub.f32 %v1773_v26, %v312_v32  ;;  %v429_v58 = vand.u32 4294901760, %v428_v39  ;;  %v442_v26 = vsub.f32 %v1911_v16, %v441_v24 }
  0x1b   : > { %v376_v33 = vand.u32 4294901760, %v375_v9  ;;  %v449_v32 = vsub.f32 %v1916_v18, %v448_v25  ;;  %v1949_v29 = vsub.f32 %v1807_v38, %v321_v44  ;;  %v462_v37 = vand.u32 4294901760, %v1936_v57 }
  0x1c   : > { %1226 = vmatprep.mubr.f32.mxu1 %v366_v50  ;;  %1423 = vmatpush3.bf16.msra.mxu1 %v1796_v35  ;;  %v415_v50 = vand.u32 4294901760, %v414_v28  ;;  %v455_v3 = vand.u32 4294901760, %v1931_v41  ;;  %v1448_v43 = vpack.c.bf16 %v436_v59, %v429_v58  ;;  %v1544_v4 = vpack.c.bf16 %v434_v12, %v427_v10 }
  0x1d   : > { %1519 = vmatpush3.bf16.msra.mxu0 %v1796_v35  ;;  %1425 = vmatprep.subr.bf16.mxu1 %v1836_v48  ;;  %v469_v5 = vand.u32 4294901760, %v1941_v60  ;;  %v443_v6 = vand.u32 4294901760, %v442_v26  ;;  %v450_v9 = vand.u32 4294901760, %v449_v32  ;;  %v476_v44 = vand.u32 4294901760, %v1949_v29 }
  0x1e   : > { %1521 = vmatprep.subr.bf16.mxu0 %v1836_v48  ;;  %v1444_v36 = vpack.c.bf16 %v422_v51, %v415_v50  ;;  %v456_v38 = vsub.f32 %v1931_v41, %v455_v3  ;;  %v1966_v10 = vsub.f32 %v1841_v49, %v327_v56  ;;  %v1548_v12 = vpack.c.bf16 %v448_v25, %v441_v24 }
  0x1f   : > { %v470_v15 = vsub.f32 %v1941_v60, %v469_v5  ;;  %v1552_v49 = vpack.c.bf16 %v462_v37, %v455_v3  ;;  %v1556_v24 = vpack.c.bf16 %v476_v44, %v469_v5  ;;  %v1468_v58 = vpack.c.bf16 %v1810_v40, %v1788_v34 }
  0x20   : > { %1427 = vmatpush3.bf16.msra.mxu1 %v1836_v48  ;;  %v457_v22 = vand.u32 4294901760, %v456_v38  ;;  %v1472_v59 = vpack.c.bf16 %v1847_v52, %v1828_v47  ;;  %v1476_v34 = vpack.c.bf16 %v1876_v62, %v1871_v61  ;;  %v1480_v40 = vpack.c.bf16 %v1887_v1, %v1882_v0  ;;  %v1083_v1 = vld [vmem:[%s2025_s3] ss:$0 sm:$0xff] }
  0x21   : > { %1523 = vmatpush3.bf16.msra.mxu0 %v1836_v48  ;;  %1429 = vmatprep.subr.bf16.mxu1 %v1859_v55  ;;  %v471_v56 = vand.u32 4294901760, %v470_v15 }
  0x22   : > { %1525 = vmatprep.subr.bf16.mxu0 %v1859_v55 }
  0x24   : > { %1431 = vmatpush3.bf16.msra.mxu1 %v1859_v55 }
  0x25   : > { %1527 = vmatpush3.bf16.msra.mxu0 %v1859_v55  ;;  %1433 = vmatprep.subr.bf16.mxu1 %v1895_v2 }
  0x26   : > { %1529 = vmatprep.subr.bf16.mxu0 %v1895_v2 }
  0x28   : > { %1435 = vmatpush3.bf16.msra.mxu1 %v1895_v2 }
  0x29   : > { %1531 = vmatpush3.bf16.msra.mxu0 %v1895_v2  ;;  %1437 = vmatprep.subr.bf16.mxu1 %v1436_v19 }
  0x2a   : > { %1533 = vmatprep.subr.bf16.mxu0 %v1532_v13 }
  0x2b   : > { %1227 = vmatmul.mubr.f32.vlgmr.msra.gmra.mrb[0].mxu1 %v376_v33 }
  0x2c   : > { %1332 = vmatmul.mubr.f32.vlgmr.msra.gmra.mrb[0].mxu0 %v374_v63  ;;  %1439 = vmatpush3.bf16.msra.mxu1 %v1436_v19  ;;  %v1540_v63 = vpack.c.bf16 %v420_v8, %v413_v7  ;;  %v463_v7 = vsub.f32 %v1936_v57, %v462_v37  ;;  %v1961_v8 = vsub.f32 %v1822_v45, %v324_v53  ;;  %v490_v53 = vand.u32 4294901760, %v1966_v10 }
  0x2d   : > { %1535 = vmatpush3.bf16.msra.mxu0 %v1532_v13  ;;  %1441 = vmatprep.subr.bf16.mxu1 %v1440_v46  ;;  %v1452_v13 = vpack.c.bf16 %v450_v9, %v443_v6  ;;  %v477_v19 = vsub.f32 %v1949_v29, %v476_v44 }
  0x2e   : > { %1537 = vmatprep.subr.bf16.mxu0 %v1536_v21  ;;  %1261 = vmatprep.mubr.f32.mxu1 %v1775_v27  ;;  %v464_v28 = vand.u32 4294901760, %v463_v7  ;;  %v483_v45 = vand.u32 4294901760, %v1961_v8  ;;  %v491_v20 = vsub.f32 %v1966_v10, %v490_v53 }
  0x2f   : > { %1366 = vmatprep.mubr.f32.mxu0 %v1775_v27  ;;  %v478_v33 = vand.u32 4294901760, %v477_v19 }
  0x30   : > { %1443 = vmatpush3.bf16.msra.mxu1 %v1440_v46  ;;  %v1456_v31 = vpack.c.bf16 %v464_v28, %v457_v22  ;;  %v484_v39 = vsub.f32 %v1961_v8, %v483_v45  ;;  %v492_v46 = vand.u32 4294901760, %v491_v20  ;;  %v1560_v51 = vpack.c.bf16 %v490_v53, %v483_v45 }
  0x31   : > { %1539 = vmatpush3.bf16.msra.mxu0 %v1536_v21  ;;  %1445 = vmatprep.subr.bf16.mxu1 %v1444_v36  ;;  %v1460_v21 = vpack.c.bf16 %v478_v33, %v471_v56 }
  0x32   : > { %1541 = vmatprep.subr.bf16.mxu0 %v1540_v63  ;;  %v485_v25 = vand.u32 4294901760, %v484_v39 }
  0x34   : > { %1447 = vmatpush3.bf16.msra.mxu1 %v1444_v36  ;;  %v1464_v50 = vpack.c.bf16 %v492_v46, %v485_v25 }
  0x35   : > { %1543 = vmatpush3.bf16.msra.mxu0 %v1540_v63  ;;  %1449 = vmatprep.subr.bf16.mxu1 %v1448_v43 }
  0x36   : > { %1545 = vmatprep.subr.bf16.mxu0 %v1544_v4 }
  0x38   : > { %1451 = vmatpush3.bf16.msra.mxu1 %v1448_v43 }
  0x39   : > { %1547 = vmatpush3.bf16.msra.mxu0 %v1544_v4  ;;  %1453 = vmatprep.subr.bf16.mxu1 %v1452_v13 }
  0x3a   : > { %1549 = vmatprep.subr.bf16.mxu0 %v1548_v12 }
  0x3c   : > { %1455 = vmatpush3.bf16.msra.mxu1 %v1452_v13 }
  0x3d   : > { %1551 = vmatpush3.bf16.msra.mxu0 %v1548_v12  ;;  %1457 = vmatprep.subr.bf16.mxu1 %v1456_v31 }
  0x3e   : > { %1553 = vmatprep.subr.bf16.mxu0 %v1552_v49 }
  0x40   : > { %1459 = vmatpush3.bf16.msra.mxu1 %v1456_v31 }
  0x41   : > { %1555 = vmatpush3.bf16.msra.mxu0 %v1552_v49  ;;  %1461 = vmatprep.subr.bf16.mxu1 %v1460_v21 }
  0x42   : > { %1557 = vmatprep.subr.bf16.mxu0 %v1556_v24 }
  0x44   : > { %1463 = vmatpush3.bf16.msra.mxu1 %v1460_v21 }
  0x45   : > { %1559 = vmatpush3.bf16.msra.mxu0 %v1556_v24  ;;  %1465 = vmatprep.subr.bf16.mxu1 %v1464_v50 }
  0x46   : > { %1561 = vmatprep.subr.bf16.mxu0 %v1560_v51 }
  0x48   : > { %1467 = vmatpush3.bf16.msra.mxu1 %v1464_v50 }
  0x49   : > { %1563 = vmatpush3.bf16.msra.mxu0 %v1560_v51  ;;  %1469 = vmatprep.subr.bf16.mxu1 %v1468_v58 }
  0x4a   : > { %1565 = vmatprep.subr.bf16.mxu0 %v1704_v11 }
  0x4b   : > { %1262 = vmatmul.mubr.f32.vlgmr.msra.gmra.mrb[0].mxu1 %v1813_v42 }
  0x4c   : > { %1367 = vmatmul.mubr.f32.vlgmr.msra.gmra.mrb[0].mxu0 %v1813_v42  ;;  %1471 = vmatpush3.bf16.msra.mxu1 %v1468_v58 }
  0x4d   : > { %1567 = vmatpush3.bf16.msra.mxu0 %v1704_v11  ;;  %1473 = vmatprep.subr.bf16.mxu1 %v1472_v59  ;;  %v1484_v11 = vpack.c.bf16 %v1916_v18, %v1911_v16 }
  0x4e   : > { %1569 = vmatprep.subr.bf16.mxu0 %v1712_v14  ;;  %1296 = vmatprep.mubr.f32.mxu1 %v1783_v30 }
  0x4f   : > { %1401 = vmatprep.mubr.f32.mxu0 %v1775_v27 }
  0x50   : > { %1475 = vmatpush3.bf16.msra.mxu1 %v1472_v59 }
  0x51   : > { %1571 = vmatpush3.bf16.msra.mxu0 %v1712_v14  ;;  %1477 = vmatprep.subr.bf16.mxu1 %v1476_v34  ;;  %v1488_v14 = vpack.c.bf16 %v1936_v57, %v1931_v41  ;;  %v984_v57 = vstv %s983_s13 }
  0x52   : > { %1573 = vmatprep.subr.bf16.mxu0 %v1734_v17 }
  0x54   : > { %1479 = vmatpush3.bf16.msra.mxu1 %v1476_v34 }
  0x55   : > { %1575 = vmatpush3.bf16.msra.mxu0 %v1734_v17  ;;  %1481 = vmatprep.subr.bf16.mxu1 %v1480_v40  ;;  %v1492_v17 = vpack.c.bf16 %v1949_v29, %v1941_v60 }
  0x56   : > { %1577 = vmatprep.subr.bf16.mxu0 %v1766_v23 }
  0x58   : > { %1483 = vmatpush3.bf16.msra.mxu1 %v1480_v40 }
  0x59   : > { %1579 = vmatpush3.bf16.msra.mxu0 %v1766_v23  ;;  %1485 = vmatprep.subr.bf16.mxu1 %v1484_v11  ;;  %v1496_v23 = vpack.c.bf16 %v1966_v10, %v1961_v8 }
  0x5a   : > { %1581 = vmatprep.subr.bf16.mxu0 %v1796_v35 }
  0x5c   : > { %1487 = vmatpush3.bf16.msra.mxu1 %v1484_v11 }
  0x5d   : > { %1583 = vmatpush3.bf16.msra.mxu0 %v1796_v35  ;;  %1489 = vmatprep.subr.bf16.mxu1 %v1488_v14 }
  0x5e   : > { %1585 = vmatprep.subr.bf16.mxu0 %v1836_v48 }
  0x60   : > { %1491 = vmatpush3.bf16.msra.mxu1 %v1488_v14 }
  0x61   : > { %1587 = vmatpush3.bf16.msra.mxu0 %v1836_v48  ;;  %1493 = vmatprep.subr.bf16.mxu1 %v1492_v17 }
  0x62   : > { %1589 = vmatprep.subr.bf16.mxu0 %v1859_v55 }
  0x64   : > { %1495 = vmatpush3.bf16.msra.mxu1 %v1492_v17 }
  0x65   : > { %1591 = vmatpush3.bf16.msra.mxu0 %v1859_v55  ;;  %1497 = vmatprep.subr.bf16.mxu1 %v1496_v23 }
  0x66   : > { %1593 = vmatprep.subr.bf16.mxu0 %v1895_v2 }
  0x68   : > { %1499 = vmatpush3.bf16.msra.mxu1 %v1496_v23 }
  0x69   : > { %1595 = vmatpush3.bf16.msra.mxu0 %v1895_v2 }
  0x6b   : > { %1297 = vmatmul.mubr.f32.vlgmr.msra.gmra.mrb[0].mxu1 %v1851_v54 }
  0x6c   : > { %1402 = vmatmul.mubr.f32.vlgmr.msra.gmra.mrb[0].mxu0 %v1813_v42 }
  0x92   : > { %v274_v27 = vpop.permute.xlu0 %273 }
  0x96   : > { %v279_v30 = vpop.permute.xlu0 %278 }
 0x13e   : > { %v1298_v35 = vpop.f32.mrb[0].mxu1 }
 0x13f   : > { %v1403_v47 = vpop.f32.mrb[0].mxu0  ;;  %v1596_v48 = vadd.f32 %v1298_v35, %v279_v30  ;;  %v639_v52 = vpop.f32.mrb[1].mxu1 }
 0x140   : > { %v955_v61 = vpop.f32.mrb[1].mxu0  ;;  %v1598_v62 = vadd.f32 %v639_v52, %v274_v27 }
 0x141   : > { %v1597_v0 = vadd.f32 %v1596_v48, %v1403_v47 }
 0x142   : > { %v1599_v55 = vadd.f32 %v1598_v62, %v955_v61 }
 0x143   : > { %v966_v16 = vmax.f32 %v1597_v0, 0.0 }
 0x144   : > { %v965_v2 = vmax.f32 %v1599_v55, 0.0 }
 0x145   : > { %v975_v42 = vmul.f32 %v1083_v1, %v966_v16 }
 0x146   : > { %v974_v54 = vmul.f32 %v1083_v1, %v965_v2 }
 0x147   : > { %v980_v41 = vsel %vm976_vm0, %v975_v42, 0.0 }
 0x148   : > { %v977_v18 = vsel %vm976_vm0, %v974_v54, 0.0 }
 0x149   : > { %978 = vadd.xlane.f32.xlu1 %v977_v18 }
 0x14d   : > { %981 = vadd.xlane.f32.xlu1 %v980_v41 }
 0x1d6   : > { %v979_v60 = vpop.xlane.xlu1 %978 }
 0x1d7   : > { %v985_v26 = vadd.f32 %v984_v57, %v979_v60 }
 0x1d9   : > { %v987_v32 = vmax.f32 %v985_v26, 0.0 }
 0x1da   : > { %v982_v3 = vpop.xlane.xlu1 %981 }
 0x1db   : > { %v989_v29 = vsub.f32 0.0, %v987_v32  ;;  %v986_v36 = vadd.f32 %v984_v57, %v982_v3 }
 0x1dd   : > { %v991_v63 = vmul.f32 1.442695, %v989_v29  ;;  %v988_v37 = vmax.f32 %v986_v36, 0.0 }
 0x1df   : > { %1618 = vpow2.f32 %v991_v63  ;;  %v990_v43 = vsub.f32 0.0, %v988_v37 }
 0x1e1   : > { %v993_v4 = vmul.f32 1.442695, %v990_v43 }
 0x1e3   : > { %1620 = vpow2.f32 %v993_v4 }
 0x1e9   : > { %v1619_v5 = vpop.eup %1618 }
 0x1ea   : > { %v995_v6 = vadd.f32 1.0, %v1619_v5 }
 0x1ec   : > { %1622 = vrcp.f32 %v995_v6 }
 0x1ed   : > { %v1621_v9 = vpop.eup %1620 }
 0x1ee   : > { %v996_v38 = vadd.f32 1.0, %v1621_v9 }
 0x1f0   : > { %1624 = vrcp.f32 %v996_v38 }
 0x1f6   : > { %v1623_v44 = vpop.eup %1622 }
 0x1f7   : > { %1002 = vst.msk [vmem:[%s249_s16] sm:$0xff] %vm1001_vm1, %v1623_v44 }
 0x1fa   : > { %v1625_v7 = vpop.eup %1624 }
 0x1fb   : > { %1003 = vst.msk [vmem:[%s249_s16 + $0x8] sm:$0xff] %vm1001_vm1, %v1625_v7 }
 0x1fc PF: > { %s16_s20 = sadd.s32 1, %s1632_s20  }
 0x1fd   : > { %p13_p4 = scmp.ge.s32.totalorder %s16_s20, 4  }
 0x1ff   :  { %15 = sbr.rel (!%p13_p4) target bundleno = 2 (0x2), region = 73 }

</bundles_post_ra>
